<compile_context>
chip_gen: v7x
topology: tpu7x:2x2x1
jax: 0.10.0
libtpu: 0.0.40
codegen_flags: <defaults>
</compile_context>

<pallas_src>
import functools

import jax
import jax.numpy as jnp
from jax.experimental import pallas as pl
from jax.experimental.pallas import tpu as pltpu


INPUT_DIM = 64
HIDDEN_DIM = 128
ACTION_DIM = 4
OUT_LANES = 128           # lane-dense output width (probs lanes 0..3, value lane 4)
FUSED_N = 2 * HIDDEN_DIM  # 256


def _round_up(n, m):
    return ((n + m - 1) // m) * m


def _is_v5e():
    try:
        kind = jax.devices()[0].device_kind.lower()
        return ("v5 lite" in kind) or ("v5e" in kind) or ("v5litepod" in kind)
    except Exception:
        return False


def _choose_batch_tile(B):
    """Batch tile: big enough to amortize ~0.35us/step, >=2 steps when possible."""
    TB_TARGET = 2048
    B = max(int(B), 1)
    if B <= 16:
        return _round_up(B, 16)
    # keep at least 2 grid steps for mid-size batches so v7x's 2 TCs both get work
    return min(TB_TARGET, _round_up((B + 1) // 2, 16))


def _policy_kernel(x_ref, w1_ref, w2_ref, w3_ref, b_ref, out_ref, *, fuse_layer2):
    bf16 = jnp.bfloat16
    x = x_ref[...]                         # (TB, 64) bf16 (cast wrapper-side)
    b1 = b_ref[0:1, :]                     # (1, 256) f32
    b2 = b_ref[1:2, :]                     # (1, 256) f32
    b3 = b_ref[2:3, 0:OUT_LANES]           # (1, 128) f32

    # ---- layer 1: actor + critic fused along N ----  (TB,64)@(64,256), f32 accum
    hg = jnp.maximum(
        jnp.dot(x, w1_ref[...], preferred_element_type=jnp.float32) + b1, 0.0)

    if fuse_layer2:
        # ---- layer 2: single 256x256 block-diagonal bf16 MXU pass (v6e/v7x) ----
        hg2 = jnp.maximum(
            jnp.dot(hg.astype(bf16), w2_ref[...],
                    preferred_element_type=jnp.float32) + b2, 0.0)
        # ---- layer 3: fused, lane-dense (logits lanes 0..3, value lane 4) ----
        raw = jnp.dot(hg2.astype(bf16), w3_ref[...],
                      preferred_element_type=jnp.float32) + b3
    else:
        # ---- v5e path: two native 128-wide dots per layer (no zero-block MXU waste),
        #      W2 arrives as a (2,128,128) stack (no structural zeros in VMEM) ----
        h2 = jnp.maximum(
            jnp.dot(hg[:, :HIDDEN_DIM].astype(bf16), w2_ref[0],
                    preferred_element_type=jnp.float32) + b2[:, :HIDDEN_DIM], 0.0)
        g2 = jnp.maximum(
            jnp.dot(hg[:, HIDDEN_DIM:].astype(bf16), w2_ref[1],
                    preferred_element_type=jnp.float32) + b2[:, HIDDEN_DIM:], 0.0)
        raw = (jnp.dot(h2.astype(bf16), w3_ref[0:HIDDEN_DIM, :],
                       preferred_element_type=jnp.float32)
               + jnp.dot(g2.astype(bf16), w3_ref[HIDDEN_DIM:, :],
                         preferred_element_type=jnp.float32)
               + b3)

    # ---- masked softmax over lanes [0, ACTION_DIM); lane ACTION_DIM carries value ----
    lane = jax.lax.broadcasted_iota(jnp.int32, raw.shape, dimension=1)
    is_logit = lane < ACTION_DIM
    m = jnp.max(jnp.where(is_logit, raw, -jnp.inf), axis=-1, keepdims=True)
    e = jnp.exp(jnp.where(is_logit, raw - m, -jnp.inf))      # exp(-inf) == 0 exactly
    denom = jnp.sum(e, axis=-1, keepdims=True)
    probs = e * pl.reciprocal(denom, approx=True)             # EUP slot, VALU stays free
    # lanes 0..3: probs, lane 4: raw value, lanes 5..127: exact zeros
    out_ref[...] = jnp.where(lane == ACTION_DIM, raw, probs)


def pack_params(p, *, fuse_layer2=None):
    """Pack the 12 Linear params into 4 slabs; weights in bf16, biases in f32."""
    if fuse_layer2 is None:
        fuse_layer2 = not _is_v5e()
    f32, bf16 = jnp.float32, jnp.bfloat16

    w1 = jnp.concatenate([p["aw1"], p["cw1"]], axis=1).astype(bf16)          # (64, 256)

    if fuse_layer2:
        w2 = jnp.zeros((FUSED_N, FUSED_N), f32)
        w2 = w2.at[:HIDDEN_DIM, :HIDDEN_DIM].set(p["aw2"])
        w2 = w2.at[HIDDEN_DIM:, HIDDEN_DIM:].set(p["cw2"])
        w2 = w2.astype(bf16)                                                  # (256, 256)
    else:
        w2 = jnp.stack([p["aw2"], p["cw2"]], axis=0).astype(bf16)            # (2,128,128)

    w3 = jnp.zeros((FUSED_N, OUT_LANES), f32)
    w3 = w3.at[:HIDDEN_DIM, :ACTION_DIM].set(p["aw3"])
    w3 = w3.at[HIDDEN_DIM:, ACTION_DIM:ACTION_DIM + 1].set(p["cw3"])
    w3 = w3.astype(bf16)                                                      # (256, 128)

    b1 = jnp.concatenate([p["ab1"], p["cb1"]], axis=1)                        # (1, 256)
    b2 = jnp.concatenate([p["ab2"], p["cb2"]], axis=1)                        # (1, 256)
    b3 = jnp.zeros((1, FUSED_N), f32)
    b3 = b3.at[:, :ACTION_DIM].set(p["ab3"])
    b3 = b3.at[:, ACTION_DIM:ACTION_DIM + 1].set(p["cb3"])                    # (1, 256)
    bias = jnp.concatenate([b1, b2, b3], axis=0).astype(f32)                  # (3, 256)
    return w1, w2, w3, bias


def simple_policy_forward(x, packed):
    """x: (B, INPUT_DIM) f32; packed = (w1, w2, w3, bias) from pack_params."""
    w1, w2, w3, bias = packed
    fuse_layer2 = (w2.ndim == 2)          # (256,256) fused vs (2,128,128) v5e split
    B = x.shape[0]

    TB = _choose_batch_tile(B)
    Bp = _round_up(B, TB)
    x = x.astype(jnp.bfloat16)            # halve the per-row input DMA
    if Bp != B:
        x = jnp.pad(x, ((0, Bp - B), (0, 0)))
    grid = (Bp // TB,)

    # VMEM budget: double-buffered x (bf16) + out (f32) tiles, single-buffered weights.
    w_bytes = 2 * (w1.size + w2.size + w3.size) + 4 * bias.size
    io_bytes = 2 * (TB * INPUT_DIM * 2 + TB * OUT_LANES * 4)
    vmem_limit = max(16 << 20, min(64 << 20, io_bytes + w_bytes + (4 << 20)))

    cost = pl.CostEstimate(
        flops=2 * Bp * (INPUT_DIM * FUSED_N + FUSED_N * FUSED_N + FUSED_N * OUT_LANES),
        transcendentals=Bp * (ACTION_DIM + 1),
        bytes_accessed=(2 * Bp * INPUT_DIM                      # x (bf16)
                        + 2 * (w1.size + w2.size + w3.size)     # weights (bf16)
                        + 4 * bias.size                         # bias (f32)
                        + 4 * Bp * OUT_LANES),                  # out (f32)
    )

    const = pl.Buffered(1)  # grid-invariant operands: no double-buffering needed
    w2_block = w2.shape     # (256,256) or (2,128,128)

    out = pl.pallas_call(
        functools.partial(_policy_kernel, fuse_layer2=fuse_layer2),
        out_shape=jax.ShapeDtypeStruct((Bp, OUT_LANES), jnp.float32),
        grid=grid,
        in_specs=[
            pl.BlockSpec((TB, INPUT_DIM), lambda i: (i, 0)),               # x: batch-tiled
            pl.BlockSpec((INPUT_DIM, FUSED_N), lambda i: (0, 0),
                         pipeline_mode=const),                             # w1
            pl.BlockSpec(w2_block, lambda i: (0,) * len(w2_block),
                         pipeline_mode=const),                             # w2
            pl.BlockSpec((FUSED_N, OUT_LANES), lambda i: (0, 0),
                         pipeline_mode=const),                             # w3
            pl.BlockSpec((3, FUSED_N), lambda i: (0, 0),
                         pipeline_mode=const),                             # bias slab
        ],
        out_specs=pl.BlockSpec((TB, OUT_LANES), lambda i: (i, 0)),          # lane-dense out
        compiler_params=pltpu.CompilerParams(
            dimension_semantics=("parallel",),                              # 2 TCs on v7x
            vmem_limit_bytes=int(vmem_limit)),
        cost_estimate=cost,
    )(x, w1, w2, w3, bias)

    probs = out[:B, :ACTION_DIM]
    value = out[:B, ACTION_DIM:ACTION_DIM + 1]
    return probs, value


def init_params(key):
    """Deterministic init matching the nn.Linear shapes (weights stored as (in,out))."""
    ks = jax.random.split(key, 12)

    def lin(kw, kb, fan_in, fan_out):
        bound = 1.0 / jnp.sqrt(fan_in)
        w = jax.random.uniform(kw, (fan_in, fan_out), jnp.float32, -bound, bound)
        b = jax.random.uniform(kb, (1, fan_out), jnp.float32, -bound, bound)
        return w, b

    p = {}
    p["aw1"], p["ab1"] = lin(ks[0], ks[1], INPUT_DIM, HIDDEN_DIM)
    p["aw2"], p["ab2"] = lin(ks[2], ks[3], HIDDEN_DIM, HIDDEN_DIM)
    p["aw3"], p["ab3"] = lin(ks[4], ks[5], HIDDEN_DIM, ACTION_DIM)
    p["cw1"], p["cb1"] = lin(ks[6], ks[7], INPUT_DIM, HIDDEN_DIM)
    p["cw2"], p["cb2"] = lin(ks[8], ks[9], HIDDEN_DIM, HIDDEN_DIM)
    p["cw3"], p["cb3"] = lin(ks[10], ks[11], HIDDEN_DIM, 1)
    return p


def reference_forward(x, p, *, mxu_bf16=False):
    """Pure-JAX reference. mxu_bf16=True mirrors the kernel's bf16-operand matmuls."""
    bf16 = jnp.bfloat16

    def mm(a, w):
        if mxu_bf16:
            return jnp.dot(a.astype(bf16), w.astype(bf16),
                           preferred_element_type=jnp.float32)
        return jnp.dot(a, w, preferred_element_type=jnp.float32)

    relu = lambda v: jnp.maximum(v, 0.0)
    h = relu(mm(x, p["aw1"]) + p["ab1"])
    h = relu(mm(h, p["aw2"]) + p["ab2"])
    logits = mm(h, p["aw3"]) + p["ab3"]
    probs = jax.nn.softmax(logits, axis=-1)
    g = relu(mm(x, p["cw1"]) + p["cb1"])
    g = relu(mm(g, p["cw2"]) + p["cb2"])
    value = mm(g, p["cw3"]) + p["cb3"]
    return probs, value


if __name__ == "__main__":
    key = jax.random.PRNGKey(0)
    k_param, k_x = jax.random.split(key)
    params = init_params(k_param)
    packed = pack_params(params)

    B = 8
    x = jax.random.normal(k_x, (B, INPUT_DIM), jnp.float32)

    probs, value = simple_policy_forward(x, packed)
    probs = jax.block_until_ready(probs)
    value = jax.block_until_ready(value)

    assert probs.shape == (B, ACTION_DIM) and value.shape == (B, 1)

    # Exact-structure check vs a reference that mirrors the kernel's bf16 matmuls
    # (tolerance covers the EUP approx-reciprocal softmax denominator).
    ref_probs_q, ref_value_q = reference_forward(x, params, mxu_bf16=True)
    assert jnp.allclose(probs, ref_probs_q, atol=2e-3, rtol=2e-3)
    assert jnp.allclose(value, ref_value_q, atol=2e-3, rtol=2e-3)

    # Sanity check vs the pure-f32 module semantics (looser: bf16 weight quantization).
    ref_probs, ref_value = reference_forward(x, params)
    assert jnp.allclose(probs, ref_probs, atol=2e-2, rtol=2e-2)
    assert jnp.allclose(value, ref_value, atol=3e-2, rtol=3e-2)
    assert jnp.allclose(jnp.sum(probs, axis=-1), 1.0, atol=2e-3)

    print("KERNEL_OK")
</pallas_src>

<mosaic_0001>
module attributes {stable_mosaic.version = 11 : i64} {
  func.func @_policy_kernel(%arg0: i32, %arg1: memref<16x64xbf16, #tpu.memory_space<vmem>>, %arg2: memref<64x256xbf16, #tpu.memory_space<vmem>>, %arg3: memref<256x256xbf16, #tpu.memory_space<vmem>>, %arg4: memref<256x128xbf16, #tpu.memory_space<vmem>>, %arg5: memref<3x256xf32, #tpu.memory_space<vmem>>, %arg6: memref<16x128xf32, #tpu.memory_space<vmem>>) attributes {dimension_semantics = [#tpu.dimension_semantics<parallel>], iteration_bounds = array<i64: 1>, scalar_prefetch = 0 : i64, scratch_operands = 0 : i64, tpu.core_type = #tpu.core_type<tc>, window_params = [{transform_indices = @transform_0, window_bounds = array<i64: 16, 64>}, {pipeline_mode = #tpu.pipeline_mode<synchronous>, transform_indices = @transform_1, window_bounds = array<i64: 64, 256>}, {pipeline_mode = #tpu.pipeline_mode<synchronous>, transform_indices = @transform_2, window_bounds = array<i64: 256, 256>}, {pipeline_mode = #tpu.pipeline_mode<synchronous>, transform_indices = @transform_3, window_bounds = array<i64: 256, 128>}, {pipeline_mode = #tpu.pipeline_mode<synchronous>, transform_indices = @transform_4, window_bounds = array<i64: 3, 256>}, {transform_indices = @transform_5, window_bounds = array<i64: 16, 128>}]} {
    %c0 = arith.constant 0 : index
    %c0_0 = arith.constant 0 : index
    %0 = vector.load %arg1[%c0, %c0_0] : memref<16x64xbf16, #tpu.memory_space<vmem>>, vector<16x64xbf16>
    %c0_1 = arith.constant 0 : index
    %c0_2 = arith.constant 0 : index
    %1 = vector.load %arg5[%c0_1, %c0_2] : memref<3x256xf32, #tpu.memory_space<vmem>>, vector<1x256xf32>
    %c1 = arith.constant 1 : index
    %c0_3 = arith.constant 0 : index
    %2 = vector.load %arg5[%c1, %c0_3] : memref<3x256xf32, #tpu.memory_space<vmem>>, vector<1x256xf32>
    %c2 = arith.constant 2 : index
    %c0_4 = arith.constant 0 : index
    %3 = vector.load %arg5[%c2, %c0_4] : memref<3x256xf32, #tpu.memory_space<vmem>>, vector<1x128xf32>
    %c0_5 = arith.constant 0 : index
    %c0_6 = arith.constant 0 : index
    %4 = vector.load %arg2[%c0_5, %c0_6] : memref<64x256xbf16, #tpu.memory_space<vmem>>, vector<64x256xbf16>
    %cst = arith.constant dense<0.000000e+00> : vector<16x256xf32>
    %5 = tpu.matmul %0, %4, %cst {dimension_numbers = #tpu.dot_dimension_numbers<[1], [0], [0], [1], [0, 0, 1, 1], [], []>} : vector<16x64xbf16>, vector<64x256xbf16>, vector<16x256xf32> -> vector<16x256xf32>
    %6 = vector.broadcast %1 : vector<1x256xf32> to vector<16x256xf32>
    %7 = arith.addf %5, %6 : vector<16x256xf32>
    %cst_7 = arith.constant 0.000000e+00 : f32
    %8 = vector.broadcast %cst_7 : f32 to vector<16x256xf32>
    %9 = arith.maximumf %7, %8 : vector<16x256xf32>
    %10 = arith.truncf %9 : vector<16x256xf32> to vector<16x256xbf16>
    %c0_8 = arith.constant 0 : index
    %c0_9 = arith.constant 0 : index
    %11 = vector.load %arg3[%c0_8, %c0_9] : memref<256x256xbf16, #tpu.memory_space<vmem>>, vector<256x256xbf16>
    %cst_10 = arith.constant dense<0.000000e+00> : vector<16x256xf32>
    %12 = tpu.matmul %10, %11, %cst_10 {dimension_numbers = #tpu.dot_dimension_numbers<[1], [0], [0], [1], [0, 0, 1, 1], [], []>} : vector<16x256xbf16>, vector<256x256xbf16>, vector<16x256xf32> -> vector<16x256xf32>
    %13 = vector.broadcast %2 : vector<1x256xf32> to vector<16x256xf32>
    %14 = arith.addf %12, %13 : vector<16x256xf32>
    %cst_11 = arith.constant 0.000000e+00 : f32
    %15 = vector.broadcast %cst_11 : f32 to vector<16x256xf32>
    %16 = arith.maximumf %14, %15 : vector<16x256xf32>
    %17 = arith.truncf %16 : vector<16x256xf32> to vector<16x256xbf16>
    %c0_12 = arith.constant 0 : index
    %c0_13 = arith.constant 0 : index
    %18 = vector.load %arg4[%c0_12, %c0_13] : memref<256x128xbf16, #tpu.memory_space<vmem>>, vector<256x128xbf16>
    %cst_14 = arith.constant dense<0.000000e+00> : vector<16x128xf32>
    %19 = tpu.matmul %17, %18, %cst_14 {dimension_numbers = #tpu.dot_dimension_numbers<[1], [0], [0], [1], [0, 0, 1, 1], [], []>} : vector<16x256xbf16>, vector<256x128xbf16>, vector<16x128xf32> -> vector<16x128xf32>
    %20 = vector.broadcast %3 : vector<1x128xf32> to vector<16x128xf32>
    %21 = arith.addf %19, %20 : vector<16x128xf32>
    %22 = tpu.iota {dimensions = array<i32: 1>} : vector<16x128xi32>
    %c4_i32 = arith.constant 4 : i32
    %23 = vector.broadcast %c4_i32 : i32 to vector<16x128xi32>
    %24 = arith.cmpi slt, %22, %23 : vector<16x128xi32>
    %cst_15 = arith.constant 0xFF800000 : f32
    %25 = vector.broadcast %cst_15 : f32 to vector<16x128xf32>
    %26 = arith.select %24, %21, %25 : vector<16x128xi1>, vector<16x128xf32>
    %cst_16 = arith.constant dense<0xFF800000> : vector<16xf32>
    %27 = vector.multi_reduction <maximumf>, %26, %cst_16 [1] : vector<16x128xf32> to vector<16xf32>
    %28 = vector.shape_cast %27 : vector<16xf32> to vector<16x1xf32>
    %29 = vector.broadcast %28 : vector<16x1xf32> to vector<16x128xf32>
    %30 = arith.subf %21, %29 : vector<16x128xf32>
    %cst_17 = arith.constant 0xFF800000 : f32
    %31 = vector.broadcast %cst_17 : f32 to vector<16x128xf32>
    %32 = arith.select %24, %30, %31 : vector<16x128xi1>, vector<16x128xf32>
    %33 = math.exp %32 : vector<16x128xf32>
    %cst_18 = arith.constant dense<0.000000e+00> : vector<16xf32>
    %34 = vector.multi_reduction <add>, %33, %cst_18 [1] : vector<16x128xf32> to vector<16xf32>
    %35 = vector.shape_cast %34 : vector<16xf32> to vector<16x1xf32>
    %36 = tpu.reciprocal %35 {approx = true} : vector<16x1xf32> -> vector<16x1xf32>
    %37 = vector.broadcast %36 : vector<16x1xf32> to vector<16x128xf32>
    %38 = arith.mulf %33, %37 : vector<16x128xf32>
    %c4_i32_19 = arith.constant 4 : i32
    %39 = vector.broadcast %c4_i32_19 : i32 to vector<16x128xi32>
    %40 = arith.cmpi eq, %22, %39 : vector<16x128xi32>
    %41 = arith.select %40, %21, %38 : vector<16x128xi1>, vector<16x128xf32>
    %c0_20 = arith.constant 0 : index
    %c0_21 = arith.constant 0 : index
    %42 = vector.load %arg6[%c0_20, %c0_21] : memref<16x128xf32, #tpu.memory_space<vmem>>, vector<16x128xf32>
    tpu.vector_store %arg6[%c0_20, %c0_21], %41 {strides = array<i32>} : memref<16x128xf32, #tpu.memory_space<vmem>>, vector<16x128xf32>,
    return
  }
  func.func @transform_0(%arg0: i32) -> (i32, i32) {
    %c0_i32 = arith.constant 0 : i32
    %c0_i32_0 = arith.constant 0 : i32
    return %arg0, %c0_i32 : i32, i32
  }
  func.func @transform_1(%arg0: i32) -> (i32, i32) {
    %c0_i32 = arith.constant 0 : i32
    %c0_i32_0 = arith.constant 0 : i32
    %c0_i32_1 = arith.constant 0 : i32
    return %c0_i32, %c0_i32_0 : i32, i32
  }
  func.func @transform_2(%arg0: i32) -> (i32, i32) {
    %c0_i32 = arith.constant 0 : i32
    %c0_i32_0 = arith.constant 0 : i32
    %c0_i32_1 = arith.constant 0 : i32
    return %c0_i32, %c0_i32_0 : i32, i32
  }
  func.func @transform_3(%arg0: i32) -> (i32, i32) {
    %c0_i32 = arith.constant 0 : i32
    %c0_i32_0 = arith.constant 0 : i32
    %c0_i32_1 = arith.constant 0 : i32
    return %c0_i32, %c0_i32_0 : i32, i32
  }
  func.func @transform_4(%arg0: i32) -> (i32, i32) {
    %c0_i32 = arith.constant 0 : i32
    %c0_i32_0 = arith.constant 0 : i32
    %c0_i32_1 = arith.constant 0 : i32
    return %c0_i32, %c0_i32_0 : i32, i32
  }
  func.func @transform_5(%arg0: i32) -> (i32, i32) {
    %c0_i32 = arith.constant 0 : i32
    %c0_i32_0 = arith.constant 0 : i32
    return %arg0, %c0_i32 : i32, i32
  }
}

</mosaic_0001>

<bundles_post_ra>
// kernel: tpu_custom_call.1
= control target key start
LH: loop header
LB: loop body
LE: loop exit
PB: predicated region body
PF: predicated region fallthrough
CT: control target
= control target key end

     0   :  { %10 = vsyncpa [#allocation3], 0  ;;  %s1100_s0 = inlined_call_operand.hbm [shape: bf16[16,64], index: 0, kind: input, shape index: {}]   ;;  %s1101_s1 = inlined_call_operand.hbm [shape: bf16[64,256], index: 1, kind: input, shape index: {}]   ;;  %s1102_s2 = inlined_call_operand.hbm [shape: bf16[256,256], index: 2, kind: input, shape index: {}]   ;;  %s1103_s3 = inlined_call_operand.hbm [shape: bf16[256,128], index: 3, kind: input, shape index: {}]   ;;  %s1104_s4 = inlined_call_operand.vmem [shape: f32[3,256], index: 4, kind: input, shape index: {}]   ;;  %s1105_s5 = inlined_call_operand.hbm [shape: f32[16,128], index: 5, kind: output, shape index: {}]  }
   0x1   :  { %11 = vsyncpa [#allocation6], 0 }
   0x2   :  { %12 = vsyncpa [#allocation9], 0 }
   0x3   :  { %13 = vsyncpa [#allocation4], 0  ;;  %s969_s18 = smov [#allocation5]   ;;  %s851_s22 = scalar_lea.hbm %s1101_s1, 1024 }
   0x4   :  { %s31_s19 = sshll.u32 %s969_s18, 4  ;;  %p852_p0 = scmp.ne.s32.totalorder %s1101_s1, %s851_s22  ;;  %s32_s19 = int_to_ptr.vmem [resolvable:$true] %s31_s19 }
   0x5   :  { %p855_p1 = scmp.lt.u32.totalorder %s851_s22, %s1101_s1 }
   0x7   :  { %p857_p2 = pnand %p855_p1, %p852_p0 }
   0x9   :  { %860 = shalt.err (!%p857_p2)
}
   0xa   :  { %s861_s27 = scalar_lea.vmem %s32_s19, 1024  ;;  %p866_p4 = scmp.lt.s32.totalorder %s32_s19, %s32_s19 }
   0xb   :  { %p862_p3 = scmp.ne.s32.totalorder %s32_s19, %s861_s27  ;;  %p867_p5 = scmp.lt.s32.totalorder %s861_s27, %s861_s27 }
   0xd   :  { %p868_p6 = por %p867_p5, %p866_p4 }
   0xf   :  { %p869_p7 = pnand %p868_p6, %p862_p3 }
  0x11   :  { %872 = shalt.err (!%p869_p7)
}
  0x12   :  { %s970_s28 = smov 128   ;;  %s971_s29 = smov 8  }
  0x13   :  { %37 = dma.hbm_to_vmem [thread:$0]  %s1101_s1, 1024, %s32_s19, [#allocation6], %s970_s28, %s970_s28, %s971_s29  }
  0x14   :  { %s972_s7 = smov [#allocation2]   ;;  %s873_s11 = scalar_lea.hbm %s1100_s0, 128 }
  0x15   :  { %s19_s8 = sshll.u32 %s972_s7, 4  ;;  %p874_p8 = scmp.ne.s32.totalorder %s1100_s0, %s873_s11  ;;  %s20_s8 = int_to_ptr.vmem [resolvable:$true] %s19_s8 }
  0x16   :  { %p877_p9 = scmp.lt.u32.totalorder %s873_s11, %s1100_s0 }
  0x18   :  { %p879_p10 = pnand %p877_p9, %p874_p8 }
  0x1a   :  { %882 = shalt.err (!%p879_p10)
}
  0x1b   :  { %s883_s16 = scalar_lea.vmem %s20_s8, 128  ;;  %p888_p12 = scmp.lt.s32.totalorder %s20_s8, %s20_s8 }
  0x1c   :  { %p884_p11 = scmp.ne.s32.totalorder %s20_s8, %s883_s16  ;;  %p889_p13 = scmp.lt.s32.totalorder %s883_s16, %s883_s16 }
  0x1e   :  { %p890_p0 = por %p889_p13, %p888_p12 }
  0x20   :  { %p891_p1 = pnand %p890_p0, %p884_p11 }
  0x22   :  { %894 = shalt.err (!%p891_p1)
}
  0x23   :  { %s973_s1 = smov 64   ;;  %s974_s17 = smov 4  }
  0x24   :  { %25 = dma.hbm_to_vmem [thread:$0]  %s1100_s0, 128, %s20_s8, [#allocation3], %s973_s1, %s973_s1, %s974_s17  }
  0x25   :  { %s975_s20 = smov [#allocation7]   ;;  %s976_s22 = smov [#allocation8]  }
  0x26   :  { %s43_s21 = sshll.u32 %s975_s20, 4  ;;  %s55_s23 = sshll.u32 %s976_s22, 4  ;;  %s44_s21 = int_to_ptr.vmem [resolvable:$true] %s43_s21  ;;  %s1039_s23 = int_to_ptr.vmem [resolvable:$true] %s55_s23 }
  0x27   :  { %s895_s26 = scalar_lea.hbm %s1102_s2, 4096 }
  0x28   :  { %p896_p2 = scmp.ne.s32.totalorder %s1102_s2, %s895_s26  ;;  %p899_p3 = scmp.lt.u32.totalorder %s895_s26, %s1102_s2 }
  0x2a   :  { %p901_p4 = pnand %p899_p3, %p896_p2 }
  0x2c   :  { %904 = shalt.err (!%p901_p4)
}
  0x2d   :  { %s905_s0 = scalar_lea.vmem %s44_s21, 4096  ;;  %p910_p6 = scmp.lt.s32.totalorder %s44_s21, %s44_s21 }
  0x2e   :  { %p906_p5 = scmp.ne.s32.totalorder %s44_s21, %s905_s0  ;;  %p911_p7 = scmp.lt.s32.totalorder %s905_s0, %s905_s0 }
  0x30   :  { %p912_p8 = por %p911_p7, %p910_p6 }
  0x32   :  { %p913_p9 = pnand %p912_p8, %p906_p5 }
  0x34   :  { %916 = shalt.err (!%p913_p9)
}
  0x35   :  { %49 = dma.hbm_to_vmem [thread:$0]  %s1102_s2, 4096, %s44_s21, [#allocation6], %s970_s28, %s970_s28, %s971_s29  }
  0x36   :  { %s917_s12 = scalar_lea.hbm %s1103_s3, 2048 }
  0x37   :  { %p918_p10 = scmp.ne.s32.totalorder %s1103_s3, %s917_s12  ;;  %p921_p11 = scmp.lt.u32.totalorder %s917_s12, %s1103_s3 }
  0x39   :  { %p923_p12 = pnand %p921_p11, %p918_p10 }
  0x3b   :  { %926 = shalt.err (!%p923_p12)
}
  0x3c   :  { %s927_s18 = scalar_lea.vmem %s1039_s23, 2048  ;;  %p932_p0 = scmp.lt.s32.totalorder %s1039_s23, %s1039_s23 }
  0x3d   :  { %p928_p13 = scmp.ne.s32.totalorder %s1039_s23, %s927_s18  ;;  %p933_p1 = scmp.lt.s32.totalorder %s927_s18, %s927_s18 }
  0x3f   :  { %p934_p2 = por %p933_p1, %p932_p0 }
  0x41   :  { %p935_p3 = pnand %p934_p2, %p928_p13 }
  0x43   :  { %938 = shalt.err (!%p935_p3)
}
  0x44   :  { %61 = dma.hbm_to_vmem [thread:$0]  %s1103_s3, 2048, %s1039_s23, [#allocation9], %s973_s1, %s973_s1, %s974_s17  }
  0x45   :  { %961 = dma.done.wait [#allocation3], 128  }
  0x46   :  { %962 = vsyncadd [#allocation3], 4294967168 }
  0x47   :  { %963 = dma.done.wait [#allocation6], 5120  }
  0x48   :  { %964 = vsyncadd [#allocation6], 4294962176 }
  0x49   :  { %965 = dma.done.wait [#allocation9], 2048  }
  0x4a   :  { %966 = vsyncadd [#allocation9], 4294965248  ;;  %v977_v0 = vmov 0   ;;  %v766_v1 = vld [vmem:[#allocation5 + $0x4] ss:$8 sps:$4 sm:$0xff]   ;;  %v778_v14 = vld [vmem:[#allocation2] sm:$0xff]   ;;  %v92_v53 = vlaneseq }
  0x4b   :  { %183 = vmatprep.mubr.bf16.mxu0 %v977_v0  ;;  %v768_v2 = vld [vmem:[#allocation5] ss:$8 sps:$4 sm:$0xff]   ;;  %151 = vmatprep.subr.bf16.mxu0 %v766_v1  ;;  %v769_v3 = vld [vmem:[#allocation5 + $0x14] ss:$8 sps:$4 sm:$0xff]   ;;  %v771_v4 = vld [vmem:[#allocation5 + $0x10] ss:$8 sps:$4 sm:$0xff]  }
  0x4c   :  { %152 = vmatpush1.bf16.msra.mxu0 %v768_v2  ;;  %v772_v5 = vld [vmem:[#allocation5 + $0x24] ss:$8 sps:$4 sm:$0xff]   ;;  %v774_v6 = vld [vmem:[#allocation5 + $0x20] ss:$8 sps:$4 sm:$0xff]   ;;  %v775_v9 = vld [vmem:[#allocation5 + $0x34] ss:$8 sps:$4 sm:$0xff]  }
  0x4d   :  { %153 = vmatprep.subr.bf16.mxu0 %v769_v3  ;;  %v779_v7 = vld [vmem:[#allocation7 + $0x4] ss:$8 sps:$4 sm:$0xff]   ;;  %v781_v8 = vld [vmem:[#allocation7] ss:$8 sps:$4 sm:$0xff]   ;;  %v782_v10 = vld [vmem:[#allocation7 + $0x14] ss:$8 sps:$4 sm:$0xff]  }
  0x4e   :  { %403 = vmatprep.subr.bf16.mxu1 %v779_v7  ;;  %v784_v11 = vld [vmem:[#allocation7 + $0x10] ss:$8 sps:$4 sm:$0xff]   ;;  %v785_v13 = vld [vmem:[#allocation7 + $0x24] ss:$8 sps:$4 sm:$0xff]   ;;  %v787_v15 = vld [vmem:[#allocation7 + $0x20] ss:$8 sps:$4 sm:$0xff]  }
  0x4f   :  { %404 = vmatpush1.bf16.msra.mxu1 %v781_v8  ;;  %v777_v12 = vld [vmem:[#allocation5 + $0x30] ss:$8 sps:$4 sm:$0xff]   ;;  %vm147_vm0 = vcmask 523264   ;;  %v788_v16 = vld [vmem:[#allocation7 + $0x34] ss:$8 sps:$4 sm:$0xff]   ;;  %v827_v42 = vld [vmem:[#allocation8 + $0x40] sm:$0xff]  }
  0x50   :  { %154 = vmatpush1.bf16.msra.mxu0 %v771_v4  ;;  %405 = vmatprep.subr.bf16.mxu1 %v782_v10  ;;  %v790_v17 = vld [vmem:[#allocation7 + $0x30] ss:$8 sps:$4 sm:$0xff]   ;;  %v791_v18 = vld [vmem:[#allocation7 + $0x44] ss:$8 sps:$4 sm:$0xff]   ;;  %v793_v19 = vld [vmem:[#allocation7 + $0x40] ss:$8 sps:$4 sm:$0xff]  }
  0x51   :  { %155 = vmatprep.subr.bf16.mxu0 %v772_v5  ;;  %v794_v20 = vld [vmem:[#allocation7 + $0x54] ss:$8 sps:$4 sm:$0xff]   ;;  %v796_v21 = vld [vmem:[#allocation7 + $0x50] ss:$8 sps:$4 sm:$0xff]   ;;  %v797_v22 = vld [vmem:[#allocation7 + $0x64] ss:$8 sps:$4 sm:$0xff]  }
  0x52   :  { %v799_v23 = vld [vmem:[#allocation7 + $0x60] ss:$8 sps:$4 sm:$0xff]   ;;  %v800_v24 = vld [vmem:[#allocation7 + $0x74] ss:$8 sps:$4 sm:$0xff]   ;;  %v802_v25 = vld [vmem:[#allocation7 + $0x70] ss:$8 sps:$4 sm:$0xff]  }
  0x53   :  { %406 = vmatpush1.bf16.msra.mxu1 %v784_v11  ;;  %v803_v26 = vld [vmem:[#allocation7 + $0x84] ss:$8 sps:$4 sm:$0xff]   ;;  %v805_v27 = vld [vmem:[#allocation7 + $0x80] ss:$8 sps:$4 sm:$0xff]   ;;  %v806_v28 = vld [vmem:[#allocation7 + $0x94] ss:$8 sps:$4 sm:$0xff]  }
  0x54   :  { %156 = vmatpush1.bf16.msra.mxu0 %v774_v6  ;;  %407 = vmatprep.subr.bf16.mxu1 %v785_v13  ;;  %v808_v29 = vld [vmem:[#allocation7 + $0x90] ss:$8 sps:$4 sm:$0xff]   ;;  %v809_v30 = vld [vmem:[#allocation7 + $0xa4] ss:$8 sps:$4 sm:$0xff]   ;;  %v811_v31 = vld [vmem:[#allocation7 + $0xa0] ss:$8 sps:$4 sm:$0xff]  }
  0x55   :  { %157 = vmatprep.subr.bf16.mxu0 %v775_v9  ;;  %v812_v32 = vld [vmem:[#allocation7 + $0xb4] ss:$8 sps:$4 sm:$0xff]   ;;  %v814_v33 = vld [vmem:[#allocation7 + $0xb0] ss:$8 sps:$4 sm:$0xff]   ;;  %v815_v34 = vld [vmem:[#allocation7 + $0xc4] ss:$8 sps:$4 sm:$0xff]  }
  0x56   :  { %v817_v35 = vld [vmem:[#allocation7 + $0xc0] ss:$8 sps:$4 sm:$0xff]   ;;  %v818_v36 = vld [vmem:[#allocation7 + $0xd4] ss:$8 sps:$4 sm:$0xff]   ;;  %v820_v37 = vld [vmem:[#allocation7 + $0xd0] ss:$8 sps:$4 sm:$0xff]  }
  0x57   :  { %408 = vmatpush1.bf16.msra.mxu1 %v787_v15  ;;  %v821_v38 = vld [vmem:[#allocation7 + $0xe4] ss:$8 sps:$4 sm:$0xff]   ;;  %v823_v39 = vld [vmem:[#allocation7 + $0xe0] ss:$8 sps:$4 sm:$0xff]   ;;  %v824_v40 = vld [vmem:[#allocation7 + $0xf4] ss:$8 sps:$4 sm:$0xff]  }
  0x58   :  { %158 = vmatpush1.bf16.msra.mxu0 %v777_v12  ;;  %409 = vmatprep.subr.bf16.mxu1 %v788_v16  ;;  %v826_v41 = vld [vmem:[#allocation7 + $0xf0] ss:$8 sps:$4 sm:$0xff]   ;;  %v828_v43 = vld [vmem:[#allocation8] sm:$0xff]   ;;  %v829_v44 = vld [vmem:[#allocation8 + $0x48] sm:$0xff]   ;;  %v93_v54 = vshrl.u32 %v92_v53, 7 }
  0x59   :  { %734 = vmatprep.subr.bf16.mxu0 %v827_v42  ;;  %v830_v45 = vld [vmem:[#allocation8 + $0x8] sm:$0xff]   ;;  %v831_v46 = vld [vmem:[#allocation8 + $0x50] sm:$0xff]   ;;  %v833_v48 = vld [vmem:[#allocation8 + $0x58] sm:$0xff]  }
  0x5a   :  { %v832_v47 = vld [vmem:[#allocation8 + $0x10] sm:$0xff]   ;;  %v834_v49 = vld [vmem:[#allocation8 + $0x18] sm:$0xff]   ;;  %v835_v50 = vld [vmem:[#allocation8 + $0x60] sm:$0xff]   ;;  %v94_v55 = vsub.s32 0, %v93_v54  ;;  %v98_v57 = vsub.s32 1, %v93_v54 }
  0x5b   :  { %684 = vmatmul.mubr.msk.bf16.vlgmr.msra.gmra.mrb[0].mxu0 %vm147_vm0, %v778_v14  ;;  %410 = vmatpush1.bf16.msra.mxu1 %v790_v17  ;;  %v836_v51 = vld [vmem:[#allocation8 + $0x20] sm:$0xff]   ;;  %v837_v52 = vld [vmem:[#allocation8 + $0x68] sm:$0xff]   ;;  %v79_v56 = vld [vmem:[%s1104_s4] ss:$4 sm:$0x3] }
  0x5c   :  { %411 = vmatprep.subr.bf16.mxu1 %v791_v18  ;;  %735 = vmatpush3.bf16.msra.mxu0 %v828_v43  ;;  %v95_v58 = vrot.slane %v79_v56, %v94_v55  ;;  %v99_v59 = vrot.slane %v79_v56, %v98_v57  ;;  %v838_v10 = vld [vmem:[#allocation8 + $0x28] sm:$0xff]   ;;  %v839_v11 = vld [vmem:[#allocation8 + $0x70] sm:$0xff]   ;;  %v841_v13 = vld [vmem:[#allocation8 + $0x78] sm:$0xff]  }
  0x5d   :  { %736 = vmatprep.subr.bf16.mxu0 %v829_v44  ;;  %v840_v12 = vld [vmem:[#allocation8 + $0x30] sm:$0xff]   ;;  %v842_v14 = vld [vmem:[#allocation8 + $0x38] sm:$0xff]  }
  0x5e   :  { %v674_v15 = vld [vmem:[%s1104_s4 + $0x1] ss:$4 sm:$0x3] }
  0x5f   :  { %412 = vmatpush1.bf16.msra.mxu1 %v793_v19  ;;  %v236_v16 = vrot.slane %v674_v15, %v94_v55  ;;  %v240_v17 = vrot.slane %v674_v15, %v98_v57 }
  0x60   :  { %413 = vmatprep.subr.bf16.mxu1 %v794_v20  ;;  %737 = vmatpush3.bf16.msra.mxu0 %v830_v45 }
  0x61   :  { %738 = vmatprep.subr.bf16.mxu0 %v831_v46 }
  0x63   :  { %414 = vmatpush1.bf16.msra.mxu1 %v796_v21 }
  0x64   :  { %415 = vmatprep.subr.bf16.mxu1 %v797_v22  ;;  %739 = vmatpush3.bf16.msra.mxu0 %v832_v47 }
  0x65   :  { %740 = vmatprep.subr.bf16.mxu0 %v833_v48 }
  0x67   :  { %416 = vmatpush1.bf16.msra.mxu1 %v799_v23 }
  0x68   :  { %417 = vmatprep.subr.bf16.mxu1 %v800_v24  ;;  %741 = vmatpush3.bf16.msra.mxu0 %v834_v49 }
  0x69   :  { %742 = vmatprep.subr.bf16.mxu0 %v835_v50 }
  0x6b   :  { %418 = vmatpush1.bf16.msra.mxu1 %v802_v25 }
  0x6c   :  { %419 = vmatprep.subr.bf16.mxu1 %v803_v26  ;;  %743 = vmatpush3.bf16.msra.mxu0 %v836_v51 }
  0x6d   :  { %744 = vmatprep.subr.bf16.mxu0 %v837_v52 }
  0x6f   :  { %420 = vmatpush1.bf16.msra.mxu1 %v805_v27 }
  0x70   :  { %421 = vmatprep.subr.bf16.mxu1 %v806_v28  ;;  %745 = vmatpush3.bf16.msra.mxu0 %v838_v10 }
  0x71   :  { %746 = vmatprep.subr.bf16.mxu0 %v839_v11 }
  0x73   :  { %422 = vmatpush1.bf16.msra.mxu1 %v808_v29 }
  0x74   :  { %423 = vmatprep.subr.bf16.mxu1 %v809_v30  ;;  %747 = vmatpush3.bf16.msra.mxu0 %v840_v12 }
  0x75   :  { %748 = vmatprep.subr.bf16.mxu0 %v841_v13 }
  0x77   :  { %424 = vmatpush1.bf16.msra.mxu1 %v811_v31 }
  0x78   :  { %425 = vmatprep.subr.bf16.mxu1 %v812_v32  ;;  %749 = vmatpush3.bf16.msra.mxu0 %v842_v14  ;;  %v626_v32 = vand.u32 127, %v92_v53 }
  0x7a   :  { %vm627_vm1 = vcmp.lt.s32.totalorder %v626_v32, 4  ;;  %vm650_vm2 = vcmp.eq.s32.totalorder %v626_v32, 4 }
  0x7b   :  { %426 = vmatpush1.bf16.msra.mxu1 %v814_v33 }
  0x7c   :  { %427 = vmatprep.subr.bf16.mxu1 %v815_v34  ;;  %v717_v34 = vld [vmem:[%s1104_s4 + $0x2] ss:$0 sm:$0xff]  ;;  %s978_s4 = smov [#allocation10]  }
  0x7d   :  { %s660_s23 = sshll.u32 %s978_s4, 4  ;;  %s661_s23 = int_to_ptr.vmem [resolvable:$true] %s660_s23 }
  0x7e   :  { %s939_s24 = scalar_lea.vmem %s661_s23, 256  ;;  %p944_p5 = scmp.lt.s32.totalorder %s661_s23, %s661_s23 }
  0x7f   :  { %428 = vmatpush1.bf16.msra.mxu1 %v817_v35  ;;  %p940_p4 = scmp.ne.s32.totalorder %s661_s23, %s939_s24  ;;  %p945_p6 = scmp.lt.s32.totalorder %s939_s24, %s939_s24 }
  0x80   :  { %429 = vmatprep.subr.bf16.mxu1 %v818_v36 }
  0x81   :  { %p946_p7 = por %p945_p6, %p944_p5 }
  0x83   :  { %430 = vmatpush1.bf16.msra.mxu1 %v820_v37  ;;  %p947_p8 = pnand %p946_p7, %p940_p4 }
  0x84   :  { %431 = vmatprep.subr.bf16.mxu1 %v821_v38 }
  0x87   :  { %432 = vmatpush1.bf16.msra.mxu1 %v823_v39 }
  0x88   :  { %433 = vmatprep.subr.bf16.mxu1 %v824_v40 }
  0x8b   :  { %434 = vmatpush1.bf16.msra.mxu1 %v826_v41 }
 0x12e   :  { %v185_v60 = vpop.f32.mrb[0].mxu0 }
 0x12f   :  { %v186_v61 = vadd.f32 %v185_v60, %v95_v58  ;;  %v187_v62 = vpop.f32.mrb[1].mxu0 }
 0x130   :  { %v188_v63 = vadd.f32 %v187_v62, %v99_v59  ;;  %v189_v0 = vpop.f32.mrb[2].mxu0 }
 0x131   :  { %v190_v1 = vadd.f32 %v189_v0, %v95_v58  ;;  %v191_v2 = vpop.f32.mrb[3].mxu0  ;;  %v194_v4 = vmax.f32 %v186_v61, 0.0 }
 0x132   :  { %v192_v3 = vadd.f32 %v191_v2, %v99_v59  ;;  %v195_v6 = vmax.f32 %v188_v63, 0.0 }
 0x133   :  { %v196_v5 = vmax.f32 %v190_v1, 0.0 }
 0x134   :  { %v197_v7 = vmax.f32 %v192_v3, 0.0 }
 0x135   :  { %v198_v8 = vpack.c.bf16 %v196_v5, %v194_v4 }
 0x136   :  { %v199_v9 = vpack.c.bf16 %v197_v7, %v195_v6 }
 0x138   :  { %435 = vmatprep.mubr.bf16.mxu1 %v199_v9 }
 0x139   :  { %436 = vmatmul.mubr.bf16.vlgmr.msra.gmra.mrb[0].mxu1 %v198_v8 }
 0x20c   :  { %v437_v18 = vpop.f32.mrb[0].mxu1 }
 0x20d   :  { %v438_v19 = vadd.f32 %v437_v18, %v236_v16  ;;  %v439_v20 = vpop.f32.mrb[1].mxu1 }
 0x20e   :  { %v440_v21 = vadd.f32 %v439_v20, %v240_v17  ;;  %v441_v22 = vpop.f32.mrb[2].mxu1 }
 0x20f   :  { %v442_v23 = vadd.f32 %v441_v22, %v236_v16  ;;  %v443_v24 = vpop.f32.mrb[3].mxu1  ;;  %v446_v26 = vmax.f32 %v438_v19, 0.0 }
 0x210   :  { %v444_v25 = vadd.f32 %v443_v24, %v240_v17  ;;  %v447_v28 = vmax.f32 %v440_v21, 0.0 }
 0x211   :  { %v448_v27 = vmax.f32 %v442_v23, 0.0 }
 0x212   :  { %v449_v29 = vmax.f32 %v444_v25, 0.0 }
 0x213   :  { %v450_v30 = vpack.c.bf16 %v448_v27, %v446_v26 }
 0x214   :  { %v451_v31 = vpack.c.bf16 %v449_v29, %v447_v28 }
 0x216   :  { %616 = vmatprep.mubr.bf16.mxu0 %v451_v31 }
 0x217   :  { %617 = vmatmul.mubr.bf16.vlgmr.msra.gmra.mrb[4].mxu0 %v450_v30 }
 0x2ea   :  { %v750_v33 = vpop.f32.mrb[4].mxu0 }
 0x2eb   :  { %v751_v35 = vpop.f32.mrb[5].mxu0 }
 0x2ec   :  { %v752_v36 = vadd.f32 %v751_v35, %v750_v33  ;;  %v753_v37 = vpop.f32.mrb[6].mxu0 }
 0x2ed   :  { %v754_v38 = vpop.f32.mrb[7].mxu0 }
 0x2ee   :  { %v619_v39 = vadd.f32 %v752_v36, %v717_v34  ;;  %v755_v40 = vadd.f32 %v754_v38, %v753_v37 }
 0x2f0   :  { %v622_v41 = vadd.f32 %v755_v40, %v717_v34  ;;  %v628_v42 = vsel %vm627_vm1, %v619_v39, -inf }
 0x2f1   :  { %630 = vmax.xlane.f32.xlu0 %v628_v42 }
 0x2f2   :  { %v629_v43 = vsel %vm627_vm1, %v622_v41, -inf }
 0x2f5   :  { %632 = vmax.xlane.f32.xlu0 %v629_v43 }
 0x37e   :  { %v631_v44 = vpop.xlane.xlu0 %630 }
 0x37f   :  { %v634_v45 = vsub.f32 %v619_v39, %v631_v44 }
 0x381   :  { %v636_v46 = vsel %vm627_vm1, %v634_v45, -inf }
 0x382   :  { %v638_v47 = vmul.f32 1.442695, %v636_v46  ;;  %v633_v48 = vpop.xlane.xlu0 %632 }
 0x383   :  { %v635_v49 = vsub.f32 %v622_v41, %v633_v48 }
 0x384   :  { %843 = vpow2.f32 %v638_v47 }
 0x385   :  { %v637_v50 = vsel %vm627_vm1, %v635_v49, -inf }
 0x386   :  { %v640_v51 = vmul.f32 1.442695, %v637_v50 }
 0x388   :  { %845 = vpow2.f32 %v640_v51 }
 0x38e   :  { %v844_v52 = vpop.eup %843 }
 0x38f   :  { %642 = vadd.xlane.f32.xlu1 %v844_v52 }
 0x392   :  { %v846_v53 = vpop.eup %845 }
 0x393   :  { %644 = vadd.xlane.f32.xlu1 %v846_v53 }
 0x41c   :  { %v643_v54 = vpop.xlane.xlu1 %642 }
 0x41d   :  { %847 = vrcp.f32 %v643_v54 }
 0x420   :  { %v645_v55 = vpop.xlane.xlu1 %644 }
 0x421   :  { %849 = vrcp.f32 %v645_v55 }
 0x427   :  { %v848_v56 = vpop.eup %847 }
 0x428   :  { %v648_v57 = vmul.f32 %v848_v56, %v844_v52 }
 0x42a   :  { %v651_v58 = vsel %vm650_vm2, %v619_v39, %v648_v57 }
 0x42b   :  { %v850_v59 = vpop.eup %849  ;;  %653 = vst [vmem:[#allocation10] sm:$0xff] %v651_v58 }
 0x42c   :  { %v649_v60 = vmul.f32 %v850_v59, %v846_v53 }
 0x42e   :  { %v652_v61 = vsel %vm650_vm2, %v622_v41, %v649_v60 }
 0x42f   :  { %654 = vst [vmem:[#allocation10 + $0x8] sm:$0xff] %v652_v61 }
 0x430   :  { %950 = shalt.err (!%p947_p8)
}
 0x431   :  { %s951_s27 = scalar_lea.hbm %s1105_s5, 256 }
 0x432   :  { %p952_p9 = scmp.ne.s32.totalorder %s1105_s5, %s951_s27  ;;  %p955_p10 = scmp.lt.u32.totalorder %s951_s27, %s1105_s5 }
 0x434   :  { %p957_p11 = pnand %p955_p10, %p952_p9 }
 0x436   :  { %960 = shalt.err (!%p957_p11)
}
 0x437   :  { %666 = dma.vmem_to_hbm [thread:$0]  %s661_s23, 256, %s1105_s5, [#allocation4], %s970_s28, %s970_s28, %s971_s29  }
 0x438   :  { %967 = dma.done.wait [#allocation4], 256  }
 0x439   :  { %968 = vsyncadd [#allocation4], 4294967040 }
 0x43a   :  { %670 = vsyncpa [#allocation3], 1 }
 0x43b   :  { %671 = vsyncpa [#allocation6], 1 }
 0x43c   :  { %672 = vsyncpa [#allocation9], 1 }
 0x43d   :  { %673 = vsyncpa [#allocation4], 1 }

</bundles_post_ra>
